<compile_context>
chip_gen: v7x
topology: tpu7x:2x2x1
jax: 0.10.0
libtpu: 0.0.40
codegen_flags: <defaults>
</compile_context>

<pallas_src>
import functools

import jax
import jax.numpy as jnp
from jax.experimental import pallas as pl
from jax.experimental.pallas import tpu as pltpu


def _sse_kernel(v_ref, pred_ref, gt_ref, out_ref, *, apply_mask, thresh1):
    # v_ref:    (R, 1)   validity scores (native dtype)
    # pred_ref: (R, HW)  predictions     (native dtype)
    # gt_ref:   (R, HW)  labels          (native dtype)
    # out_ref:  (R, 1)   per-row (per-keypoint) sum of squared error, f32
    pred = pred_ref[...].astype(jnp.float32)
    gt = gt_ref[...].astype(jnp.float32)
    if apply_mask:
        # torch semantics: mask gt only (pred is NOT masked).
        w = (v_ref[...] > thresh1).astype(jnp.float32)        # (R, 1)
        gt = gt * w                                           # lane broadcast
    d = pred - gt
    out_ref[...] = jnp.sum(d * d, axis=-1, keepdims=True)


def _choose_row_tile(n_rows, hw, itemsize):
    """Row tile R: multiple of 8, ~2 MiB per (R, HW) input block,
    and at least 2 grid steps when there is enough work (v7x has 2 TCs)."""
    target_bytes = 2 * 1024 * 1024
    r = max(8, (target_bytes // max(1, hw * itemsize)) // 8 * 8)
    if n_rows >= 16:
        half = (n_rows + 1) // 2
        half = ((half + 7) // 8) * 8
        r = min(r, half)
    if r >= n_rows:
        r = n_rows                 # block == full dim is always legal
    return r


def _per_row_sse(valid, pred, gt, *, apply_mask, thresh1):
    """valid: (N, 1); pred/gt: (N, HW) native dtype -> (N,) f32 row SSE."""
    N, HW = pred.shape
    itemsize = jnp.dtype(pred.dtype).itemsize
    R = _choose_row_tile(N, HW, itemsize)
    grid = pl.cdiv(N, R)
    kernel = functools.partial(_sse_kernel, apply_mask=apply_mask,
                               thresh1=thresh1)
    out = pl.pallas_call(
        kernel,
        out_shape=jax.ShapeDtypeStruct((N, 1), jnp.float32),
        grid_spec=pltpu.PrefetchScalarGridSpec(
            num_scalar_prefetch=0,
            grid=(grid,),
            in_specs=[
                pl.BlockSpec((R, 1), lambda i: (i, 0)),
                pl.BlockSpec((R, HW), lambda i: (i, 0)),
                pl.BlockSpec((R, HW), lambda i: (i, 0)),
            ],
            out_specs=pl.BlockSpec((R, 1), lambda i: (i, 0)),
        ),
        compiler_params=pltpu.CompilerParams(
            dimension_semantics=("parallel",)),
    )(valid, pred, gt)
    return out[:, 0]                                   # (N,)


@functools.partial(
    jax.jit, static_argnames=("has_ohkm", "topk", "thresh1", "thresh2"))
def joints_l2_loss(output, valid, label, has_ohkm=False, topk=8,
                   thresh1=1, thresh2=0):
    """Pallas implementation of JointsL2Loss.forward.

    output/label: (B, K, H, W) any float dtype;  valid: (B, K, 1).
    """
    assert output.shape == label.shape
    B, K = output.shape[0], output.shape[1]
    HW = 1
    for d in output.shape[2:]:
        HW *= d
    N = B * K

    pred = output.reshape(N, HW)        # native dtype, contiguous reshape
    gt = label.reshape(N, HW)
    v = valid.reshape(N, 1)

    sse = _per_row_sse(v, pred, gt, apply_mask=not has_ohkm,
                       thresh1=thresh1)                 # (N,) f32
    sse = sse.reshape(B, K)

    if not has_ohkm:
        # nn.MSELoss(reduction='mean') over (K, HW) per sample, then /B.
        per_sample = jnp.sum(sse, axis=1) / (K * HW)
        return jnp.sum(per_sample) / B
    else:
        per_joint = sse / HW                            # mean over HW
        w2 = (valid.reshape(B, K) > thresh2).astype(jnp.float32)
        per_joint = per_joint * w2
        # TODO(synk): top-k hard-keypoint mining has no clean in-kernel Pallas
        # equivalent; done with lax.top_k in glue (same values as torch.topk).
        topk_val, _ = jax.lax.top_k(per_joint, topk)
        sample_loss = jnp.mean(topk_val, axis=1)
        return jnp.sum(sample_loss) / B


def joints_l2_loss_ref(output, valid, label, has_ohkm=False, topk=8,
                       thresh1=1, thresh2=0):
    """Pure-JAX reference mirroring the PyTorch per-sample loop."""
    B, K = output.shape[0], output.shape[1]
    HW = 1
    for d in output.shape[2:]:
        HW *= d
    loss = 0.0
    for i in range(B):
        pred = output[i].reshape(K, HW).astype(jnp.float32)
        gt = label[i].reshape(K, HW).astype(jnp.float32)
        if not has_ohkm:
            weight = (valid[i] > thresh1).astype(jnp.float32)   # (K, 1)
            gt = gt * weight
            sample_loss = jnp.mean((pred - gt) ** 2)
        else:
            tmp = jnp.mean((pred - gt) ** 2, axis=1)            # (K,)
            weight = (jnp.squeeze(valid[i]) > thresh2).astype(jnp.float32)
            tmp = tmp * weight
            topk_val, _ = jax.lax.top_k(tmp, topk)
            sample_loss = jnp.mean(topk_val)
        loss = loss + sample_loss
    return loss / B


if __name__ == "__main__":
    key = jax.random.PRNGKey(0)
    k1, k2, k3 = jax.random.split(key, 3)

    B, K, H, W = 2, 8, 16, 16
    output = jax.random.normal(k1, (B, K, H, W), jnp.float32)
    label = jax.random.normal(k2, (B, K, H, W), jnp.float32)
    # valid in [0, 2) so the (valid > 1) mask is non-trivial.
    valid = jax.random.uniform(k3, (B, K, 1), jnp.float32, 0.0, 2.0)

    # Default path (has_ohkm=False) -- masked mean MSE.
    loss = joints_l2_loss(output, valid, label)
    jax.block_until_ready(loss)
    ref = joints_l2_loss_ref(output, valid, label)
    assert jnp.allclose(loss, ref, rtol=1e-5, atol=1e-6), (loss, ref)

    # OHKM path (top-k hard keypoint mining).
    loss_ohkm = joints_l2_loss(output, valid, label, has_ohkm=True, topk=4)
    jax.block_until_ready(loss_ohkm)
    ref_ohkm = joints_l2_loss_ref(output, valid, label, has_ohkm=True, topk=4)
    assert jnp.allclose(loss_ohkm, ref_ohkm, rtol=1e-5, atol=1e-6), (
        loss_ohkm, ref_ohkm)

    # bf16 inputs: native-dtype HBM traffic, in-kernel f32 cast/accumulation.
    out_bf = output.astype(jnp.bfloat16)
    lab_bf = label.astype(jnp.bfloat16)
    loss_bf = joints_l2_loss(out_bf, valid, lab_bf)
    jax.block_until_ready(loss_bf)
    ref_bf = joints_l2_loss_ref(out_bf, valid, lab_bf)
    assert jnp.allclose(loss_bf, ref_bf, rtol=1e-5, atol=1e-6), (loss_bf, ref_bf)

    print("KERNEL_OK")
</pallas_src>

<mosaic_0001>
module attributes {stable_mosaic.version = 11 : i64} {
  func.func @_sse_kernel(%arg0: i32, %arg1: memref<8x1xf32, #tpu.memory_space<vmem>>, %arg2: memref<8x256xf32, #tpu.memory_space<vmem>>, %arg3: memref<8x256xf32, #tpu.memory_space<vmem>>, %arg4: memref<8x1xf32, #tpu.memory_space<vmem>>) attributes {dimension_semantics = [#tpu.dimension_semantics<parallel>], iteration_bounds = array<i64: 2>, scalar_prefetch = 0 : i64, scratch_operands = 0 : i64, tpu.core_type = #tpu.core_type<tc>, window_params = [{transform_indices = @transform_0, window_bounds = array<i64: 8, 1>}, {transform_indices = @transform_1, window_bounds = array<i64: 8, 256>}, {transform_indices = @transform_2, window_bounds = array<i64: 8, 256>}, {transform_indices = @transform_3, window_bounds = array<i64: 8, 1>}]} {
    %c0 = arith.constant 0 : index
    %c0_0 = arith.constant 0 : index
    %0 = vector.load %arg2[%c0, %c0_0] : memref<8x256xf32, #tpu.memory_space<vmem>>, vector<8x256xf32>
    %c0_1 = arith.constant 0 : index
    %c0_2 = arith.constant 0 : index
    %1 = vector.load %arg3[%c0_1, %c0_2] : memref<8x256xf32, #tpu.memory_space<vmem>>, vector<8x256xf32>
    %c0_3 = arith.constant 0 : index
    %c0_4 = arith.constant 0 : index
    %2 = vector.load %arg1[%c0_3, %c0_4] : memref<8x1xf32, #tpu.memory_space<vmem>>, vector<8x1xf32>
    %cst = arith.constant 1.000000e+00 : f32
    %3 = vector.broadcast %cst : f32 to vector<8x1xf32>
    %4 = arith.cmpf ogt, %2, %3 : vector<8x1xf32>
    %5 = arith.extui %4 : vector<8x1xi1> to vector<8x1xi32>
    %6 = arith.sitofp %5 : vector<8x1xi32> to vector<8x1xf32>
    %7 = vector.broadcast %6 : vector<8x1xf32> to vector<8x256xf32>
    %8 = arith.mulf %1, %7 : vector<8x256xf32>
    %9 = arith.subf %0, %8 : vector<8x256xf32>
    %10 = arith.mulf %9, %9 : vector<8x256xf32>
    %cst_5 = arith.constant dense<0.000000e+00> : vector<8xf32>
    %11 = vector.multi_reduction <add>, %10, %cst_5 [1] : vector<8x256xf32> to vector<8xf32>
    %12 = vector.shape_cast %11 : vector<8xf32> to vector<8x1xf32>
    %c0_6 = arith.constant 0 : index
    %c0_7 = arith.constant 0 : index
    %13 = vector.load %arg4[%c0_6, %c0_7] : memref<8x1xf32, #tpu.memory_space<vmem>>, vector<8x1xf32>
    tpu.vector_store %arg4[%c0_6, %c0_7], %12 {strides = array<i32>} : memref<8x1xf32, #tpu.memory_space<vmem>>, vector<8x1xf32>,
    return
  }
  func.func @transform_0(%arg0: i32) -> (i32, i32) {
    %c0_i32 = arith.constant 0 : i32
    %c0_i32_0 = arith.constant 0 : i32
    return %arg0, %c0_i32 : i32, i32
  }
  func.func @transform_1(%arg0: i32) -> (i32, i32) {
    %c0_i32 = arith.constant 0 : i32
    %c0_i32_0 = arith.constant 0 : i32
    return %arg0, %c0_i32 : i32, i32
  }
  func.func @transform_2(%arg0: i32) -> (i32, i32) {
    %c0_i32 = arith.constant 0 : i32
    %c0_i32_0 = arith.constant 0 : i32
    return %arg0, %c0_i32 : i32, i32
  }
  func.func @transform_3(%arg0: i32) -> (i32, i32) {
    %c0_i32 = arith.constant 0 : i32
    %c0_i32_0 = arith.constant 0 : i32
    return %arg0, %c0_i32 : i32, i32
  }
}

</mosaic_0001>

<bundles_post_ra>
// kernel: squeeze.1
= control target key start
LH: loop header
LB: loop body
LE: loop exit
PB: predicated region body
PF: predicated region fallthrough
CT: control target
= control target key end

     0   :  { %vm7_vm0 = vcmask 64512   ;;  %s39_s0 = inlined_call_operand.vmem [shape: f32[16], index: 0, kind: input, shape index: {}]   ;;  %s40_s1 = inlined_call_operand.vmem [shape: f32[2,8], index: 1, kind: output, shape index: {}]  }
   0x1   :  { %v4_v0 = vld [vmem:[%s39_s0] sm:$0x1]  ;;  %s22_s0 = smov 120  }
   0x2   :  { %5 = vst [vmem:[#allocation1] sm:$0x1] %v4_v0 }
   0x9   :  { %v9_v1 = vld [vmem:[#allocation1] sm:$0x1]  }
   0xa   :  { %v6_v2 = vld [vmem:[#allocation1] sm:$0x1]   ;;  %10 = vrot.lane.b32.xlu0 %v9_v1, %s22_s0 }
   0xb   :  { %8 = vst.msk [vmem:[#allocation0] sm:$0x1] %vm7_vm0, %v6_v2  }
  0x7c   :  { %v11_v3 = vpop.permute.xlu0 %10  }
  0x7d   :  { %14 = vst.msk [vmem:[#allocation0 + $0x1] sm:$0x1] %vm7_vm0, %v11_v3  }
  0x84   :  { %v18_v4 = vld [vmem:[#allocation0] sm:$0x3] }
  0x85   :  { %20 = vst [vmem:[%s40_s1] sm:$0x3] %v18_v4 }

// kernel: joints_l2_loss.1
= control target key start
LH: loop header
LB: loop body
LE: loop exit
PB: predicated region body
PF: predicated region fallthrough
CT: control target
= control target key end

     0   :  { %s364_s12 = smov 0   ;;  %s387_s0 = inlined_call_operand.vmem [shape: f32[16,1], index: 0, kind: input, shape index: {}]   ;;  %s388_s1 = inlined_call_operand.vmem [shape: f32[16,256], index: 1, kind: input, shape index: {}]   ;;  %s389_s2 = inlined_call_operand.vmem [shape: f32[16,256], index: 2, kind: input, shape index: {}]   ;;  %s390_s3 = inlined_call_operand.vmem [shape: f32[16,1], index: 3, kind: output, shape index: {}]  }
   0x1 LB: > { %s307_s13 = sadd.s32 4294967295, %s340_s12   ;;  %p311_p0 = scmp.ge.s32.totalorder %s340_s12, 1  ;;  %s340_s12 = sphi %s364_s12, %s13_s12  }
   0x2   : > { %p156_p1 = scmp.lt.s32.totalorder %s340_s12, 3 }
   0x4   : > { %p157_p2 = pnand %p311_p0, %p156_p1 }
   0x5   : > { %p188_p3 = scmp.lt.s32.totalorder (!%p157_p2), %s307_s13, 1  ;;  %v342_v0 = vmov (!%p157_p2), 0   ;;  %v343_v2 = vmov (!%p157_p2), 0.0   ;;  %vm228_vm1 = vcmask (!%p157_p2), 7168  }
   0x6   : > { %160 = sbr.rel (%p157_p2) target bundleno = 298 (0x12a), region = 32  ;;  %333 = vset.pattern.permute.xlu0 (!%p157_p2), %v342_v0 }
   0xd   : > { %s392_s13 = smov (!%p188_p3, %s307_s13), 1 }
   0xe   : > { %s312_s14 = sshll.u32 %s392_s13, 3  ;;  %s321_s18 = sshll.u32 %s392_s13, 4 }
   0xf   : > { %s191_s17 = scalar_lea.vmem %s387_s0, %s312_s14  ;;  %s201_s21 = scalar_lea.vmem %s389_s2, %s321_s18 }
  0x10   : > { %v210_v1 = vld [vmem:[%s191_s17] sm:$0xff]  ;;  %s196_s24 = scalar_lea.vmem %s388_s1, %s321_s18  ;;  %v209_v5 = vld [vmem:[%s201_s21 + $0x8] sm:$0xff]  ;;  %s205_s27 = scalar_lea.vmem %s390_s3, %s312_s14 }
  0x11   : > { %vm211_vm0 = vcmp.gt.f32.partialorder %v210_v1, 1.0  ;;  %v208_v4 = vld [vmem:[%s201_s21] sm:$0xff]  ;;  %v207_v7 = vld [vmem:[%s196_s24 + $0x8] sm:$0xff] }
  0x12   : > { %v318_v3 = vsel %vm211_vm0, 1.0, %v343_v2  ;;  %v206_v6 = vld [vmem:[%s196_s24] sm:$0xff] }
  0x13   : > { %216 = vperm.xlu0 %333, %v318_v3  }
  0x92   : > { %v217_v8 = vpop.permute.xlu0 %216 }
  0x93   : > { %v219_v9 = vmul.f32 %v217_v8, %v208_v4  ;;  %v220_v10 = vmul.f32 %v217_v8, %v209_v5 }
  0x95   : > { %v221_v11 = vsub.f32 %v206_v6, %v219_v9  ;;  %v222_v12 = vsub.f32 %v207_v7, %v220_v10 }
  0x97   : > { %v223_v13 = vmul.f32 %v221_v11, %v221_v11  ;;  %v224_v14 = vmul.f32 %v222_v12, %v222_v12 }
  0x99   : > { %v225_v15 = vadd.f32 %v224_v14, %v223_v13 }
  0x9b   : > { %226 = vadd.xlane.f32.xlu0 %v225_v15 }
 0x128   : > { %v227_v16 = vpop.xlane.xlu0 %226 }
 0x129   : > { %229 = vst.msk [vmem:[%s205_s27] sm:$0xff] %vm228_vm1, %v227_v16 }
 0x12a PF: > { %s13_s12 = sadd.s32 1, %s340_s12  }
 0x12b   : > { %p10_p4 = scmp.ge.s32.totalorder %s13_s12, 4  }
 0x12d   :  { %12 = sbr.rel (!%p10_p4) target bundleno = 1 (0x1), region = 68 }

</bundles_post_ra>
